<compile_context>
chip_gen: v6e
topology: v6e:2x2x1
jax: 0.10.0
libtpu: 0.0.40
codegen_flags: <defaults>
</compile_context>

<pallas_src>
import numpy as np
import jax
import jax.numpy as jnp
from jax.experimental import pallas as pl
from jax.experimental.pallas import tpu as pltpu

_INV_SQRT2 = 0.7071067811865476
_LN_EPS = 1e-5


# ----------------------------------------------------------------------------- kernels
def _dense_gelu_kernel(x_ref, wT_ref, bd_ref, h_ref, acc_ref):
    """grid = (Nb, Kb):  h[:, n] = gelu(x @ W^T[:, n] + b[n]), K-reduced into acc."""
    n = pl.program_id(0)
    k = pl.program_id(1)
    tk = wT_ref.shape[0]
    tn = acc_ref.shape[1]

    @pl.when(k == 0)
    def _():
        # Fold the dense bias into the accumulator init (saves an epilogue add).
        ns = n * tn
        if tn % 128 == 0:
            ns = pl.multiple_of(ns, 128)
        acc_ref[...] = jnp.zeros_like(acc_ref) + bd_ref[:, pl.ds(ns, tn)]

    # x stays fully resident in VMEM; only the weight tile streams per step.
    ks = k * tk
    if tk % 128 == 0:
        ks = pl.multiple_of(ks, 128)
    acc_ref[...] += jnp.dot(x_ref[:, pl.ds(ks, tk)], wT_ref[...],
                            preferred_element_type=jnp.float32)

    @pl.when(k == pl.num_programs(1) - 1)
    def _():
        a = acc_ref[...]
        # exact GELU (matches torch.nn.functional.gelu default)
        h_ref[...] = 0.5 * a * (1.0 + jax.lax.erf(a * _INV_SQRT2))


def _ln_decoder_kernel(h_ref, g_ref, b_ref, wd_ref, bd_ref, idx_ref, out_ref):
    """LayerNorm over the full feature row + IdxSelMLP decoder + per-sample select."""
    h = h_ref[...]                                           # (Bp, D) f32
    # Note: padded (all-zero-input) rows go through LayerNorm with tiny variance;
    # the result stays finite (≈ beta) and is sliced off in the wrapper.
    mean = jnp.mean(h, axis=-1, keepdims=True)
    cent = h - mean
    var = jnp.mean(cent * cent, axis=-1, keepdims=True)      # biased variance
    h = cent * jax.lax.rsqrt(var + _LN_EPS)
    h = h * g_ref[...] + b_ref[...]

    # Decoder over ALL options in one packed bf16 matmul (f32 accumulation).
    allo = jnp.dot(h.astype(jnp.bfloat16), wd_ref[...],
                   preferred_element_type=jnp.float32)       # (Bp, O*C)

    # Per-sample option selection: mask built in-kernel from the (Bp,1) int32
    # index (no one-hot DMA).  O is small & static; everything fits one vreg.
    idx = idx_ref[...]                                       # (Bp, 1) int32
    C = out_ref.shape[1]
    O = allo.shape[1] // C
    logits = jnp.zeros_like(out_ref) + bd_ref[...]           # bias row 0 (as in torch)
    for o in range(O):
        logits = logits + jnp.where(idx == o, allo[:, o * C:(o + 1) * C], 0.0)
    out_ref[...] = logits


# ----------------------------------------------------------------------------- tiling
def _vmem_capacity_bytes():
    try:
        return int(pltpu.get_tpu_info().vmem_capacity_bytes)
    except Exception:
        return 64 * 1024 * 1024          # conservative (v7x-sized) fallback


def _vmem_limit_bytes(needed, cap):
    # Explicit scoped-VMEM limit (defaults are only 16/32 MiB): generous headroom,
    # but never more than ~3/4 of physical VMEM (v7x has only 64 MiB per core).
    return int(min(max(2 * needed, 32 * 1024 * 1024), cap * 3 // 4))


def _choose_block_n(D):
    """Split the output-feature dim in half (when 128-legal) so the 'parallel'
    grid axis can shard the weight stream across both v7x TensorCores.
    On 1-TC chips (v5e/v6e) this is a no-op for total DMA bytes/step count."""
    return D // 2 if D % 256 == 0 else D


def _choose_block_k(D, tn, vmem_cap):
    """Largest multiple-of-128 divisor of D whose double-buffered bf16 (tk, tn)
    weight tile fits a generation-aware VMEM budget (bigger tiles amortize the
    ~0.35 us per-grid-step overhead, which dominates on v7x's fast HBM)."""
    if D % 128 != 0:
        return D
    budget = min(vmem_cap // 3, 48 * 1024 * 1024)        # double-buffered W^T bytes
    cap_elems = max(budget // (2 * 2 * tn), 128)          # 2 bufs * 2 B/elem * tn cols
    tk = 128
    for cand in range(128, D + 1, 128):
        if D % cand == 0 and cand <= cap_elems:
            tk = cand
    return tk


# ----------------------------------------------------------------------------- wrapper
def prepare_params(params):
    """One-time param prep (outside the hot path): transpose + bf16-cast the dense
    weight, pack the per-option decoder weights into a single bf16 (D, O*C) matrix."""
    D = params["w_dense"].shape[1]
    O, _, C = params["w_dec"].shape
    return dict(
        w_dense_T=params["w_dense"].T.astype(jnp.bfloat16),                 # (D_in, D_out)
        b_dense=params["b_dense"].reshape(1, D).astype(jnp.float32),
        ln_gamma=params["ln_gamma"].reshape(1, D).astype(jnp.float32),
        ln_beta=params["ln_beta"].reshape(1, D).astype(jnp.float32),
        w_dec_packed=jnp.transpose(params["w_dec"], (1, 0, 2))
                        .reshape(D, O * C).astype(jnp.bfloat16),            # (D, O*C) bf16
        b_dec0=params["b_dec"][0].reshape(1, C).astype(jnp.float32),        # (1, C)
        n_options=int(O),
        n_classes=int(C),
    )


def finetune_head_forward(x, true_false, prep, *, block_k=None, block_n=None):
    """x: (B, L_keep, S, E) hidden states; true_false: (B,) int option index.

    Note: as in the torch reference, an idx outside [0, n_options) silently
    yields bias-only logits (torch would raise); callers should validate idx.
    x / W_dense / W_dec are deliberately rounded to bf16 (f32 accumulation);
    this is an intentional precision deviation from the f32 torch model.
    """
    B = x.shape[0]
    D = int(np.prod(x.shape[1:]))
    O, C = prep["n_options"], prep["n_classes"]
    OC = O * C

    # Pad batch to the bf16 sublane tile (16) so the M dimension is MXU-legal.
    Bp = ((B + 15) // 16) * 16
    x2 = jnp.zeros((Bp, D), jnp.bfloat16).at[:B].set(x.reshape(B, D).astype(jnp.bfloat16))
    idx = jnp.zeros((Bp, 1), jnp.int32).at[:B, 0].set(true_false.astype(jnp.int32))

    vmem_cap = _vmem_capacity_bytes()
    tn = block_n if block_n is not None else _choose_block_n(D)
    tk = block_k if block_k is not None else _choose_block_k(D, tn, vmem_cap)
    assert D % tn == 0 and D % tk == 0, f"D={D} must be divisible by tn={tn}, tk={tk}"
    Nb, Kb = D // tn, D // tk

    # ---- kernel A: dense + bias + GELU ----------------------------------------------
    need_a = (2 * Bp * D * 2            # resident x (double-buffered)
              + 2 * tk * tn * 2         # weight tile double buffer
              + 2 * Bp * tn * 4         # output block double buffer
              + Bp * tn * 4             # accumulator scratch
              + 2 * D * 4               # resident bias
              + (1 << 20))              # Mosaic-internal headroom
    h = pl.pallas_call(
        _dense_gelu_kernel,
        out_shape=jax.ShapeDtypeStruct((Bp, D), jnp.float32),
        grid_spec=pltpu.PrefetchScalarGridSpec(
            num_scalar_prefetch=0,
            grid=(Nb, Kb),
            in_specs=[
                pl.BlockSpec((Bp, D), lambda n, k: (0, 0)),    # x, fully resident (bf16)
                pl.BlockSpec((tk, tn), lambda n, k: (k, n)),   # W_dense^T tile (bf16)
                pl.BlockSpec((1, D), lambda n, k: (0, 0)),     # b_dense, resident
            ],
            out_specs=pl.BlockSpec((Bp, tn), lambda n, k: (0, n)),
            scratch_shapes=[pltpu.VMEM((Bp, tn), jnp.float32)],  # f32 accumulator
        ),
        compiler_params=pltpu.CompilerParams(
            dimension_semantics=("parallel", "arbitrary"),       # N across cores, K reduce
            vmem_limit_bytes=_vmem_limit_bytes(need_a, vmem_cap)),
        cost_estimate=pl.CostEstimate(
            flops=2 * Bp * D * D,
            transcendentals=Bp * D,
            bytes_accessed=D * D * 2 + Bp * D * 2 + Bp * D * 4 + D * 4),
    )(x2, prep["w_dense_T"], prep["b_dense"])

    # ---- kernel B: LayerNorm + IdxSelMLP decoder --------------------------------------
    need_b = 2 * Bp * D * 4 + 4 * D * 4 + 2 * D * OC * 2 + (1 << 20)
    out = pl.pallas_call(
        _ln_decoder_kernel,
        out_shape=jax.ShapeDtypeStruct((Bp, C), jnp.float32),
        grid_spec=pltpu.PrefetchScalarGridSpec(
            num_scalar_prefetch=0,
            grid=(1,),
            in_specs=[
                pl.BlockSpec((Bp, D), lambda i: (0, 0)),       # h (f32)
                pl.BlockSpec((1, D), lambda i: (0, 0)),        # gamma
                pl.BlockSpec((1, D), lambda i: (0, 0)),        # beta
                pl.BlockSpec((D, OC), lambda i: (0, 0)),       # packed decoder (bf16)
                pl.BlockSpec((1, C), lambda i: (0, 0)),        # b_dec[0]
                pl.BlockSpec((Bp, 1), lambda i: (0, 0)),       # per-sample option idx
            ],
            out_specs=pl.BlockSpec((Bp, C), lambda i: (0, 0)),
        ),
        compiler_params=pltpu.CompilerParams(
            dimension_semantics=("arbitrary",),
            vmem_limit_bytes=_vmem_limit_bytes(need_b, vmem_cap)),
        cost_estimate=pl.CostEstimate(
            flops=2 * Bp * D * OC + 8 * Bp * D,
            transcendentals=2 * Bp,
            bytes_accessed=Bp * D * 4 + 2 * D * 4 + D * OC * 2 + Bp * 4 + Bp * C * 4),
    )(h, prep["ln_gamma"], prep["ln_beta"], prep["w_dec_packed"], prep["b_dec0"], idx)
    return out[:B]


# ----------------------------------------------------------------------------- init + ref
def init_params(key, D, n_classes=2, options=2):
    k1, k2, k3 = jax.random.split(key, 3)
    lim = 1.0 / np.sqrt(D)
    w_dense = jax.random.uniform(k1, (D, D), jnp.float32, -lim, lim)   # (out, in)
    b_dense = jax.random.uniform(k2, (D,), jnp.float32, -lim, lim)
    ln_gamma = jnp.ones((D,), jnp.float32)
    ln_beta = jnp.zeros((D,), jnp.float32)
    std = np.sqrt(2.0 / (D + n_classes))                               # xavier_normal_
    w_dec = std * jax.random.normal(k3, (options, D, n_classes), jnp.float32)
    b_dec = jnp.zeros((options, n_classes), jnp.float32)
    return dict(w_dense=w_dense, b_dense=b_dense, ln_gamma=ln_gamma,
                ln_beta=ln_beta, w_dec=w_dec, b_dec=b_dec)


def reference_forward(x, true_false, params):
    """Pure-JAX reference using the same bf16-rounded matmul operands as the kernel."""
    B = x.shape[0]
    D = int(np.prod(x.shape[1:]))
    xq = x.reshape(B, D).astype(jnp.bfloat16).astype(jnp.float32)
    wq = params["w_dense"].astype(jnp.bfloat16).astype(jnp.float32)
    h = xq @ wq.T + params["b_dense"]
    h = 0.5 * h * (1.0 + jax.lax.erf(h * _INV_SQRT2))
    mean = h.mean(-1, keepdims=True)
    var = ((h - mean) ** 2).mean(-1, keepdims=True)
    h = (h - mean) * jax.lax.rsqrt(var + _LN_EPS) * params["ln_gamma"] + params["ln_beta"]
    hq = h.astype(jnp.bfloat16).astype(jnp.float32)
    wdq = params["w_dec"].astype(jnp.bfloat16).astype(jnp.float32)
    w_sel = wdq[true_false]                                 # (B, D, C)
    logits = jnp.einsum("bd,bdc->bc", hq, w_sel) + params["b_dec"][0]
    return logits


# ----------------------------------------------------------------------------- main
if __name__ == "__main__":
    # TODO(synk): the frozen transformer / tokenizer / hidden-state cache of
    # FineTuneModel is not translatable to a kernel; its output is synthesized.
    key = jax.random.PRNGKey(0)
    kx, kp = jax.random.split(key)

    B, L_keep, S, E = 2, 1, 8, 32            # batch, kept layers, kept seq, emb
    D = L_keep * S * E                       # 256 = emb_size * keep_seq_len
    n_classes, options = 2, 2

    x = jax.random.normal(kx, (B, L_keep, S, E), jnp.float32)   # "responses"
    true_false = jnp.array([0, 1], dtype=jnp.int32)             # per-sample option idx
    params = init_params(kp, D, n_classes, options)
    prep = prepare_params(params)

    # block_k=128 -> Kb=2 and (D=256) -> Nb=2, so both the parallel-N and the
    # pipelined K-reduction grid paths are exercised.
    logits = finetune_head_forward(x, true_false, prep, block_k=128)
    jax.block_until_ready(logits)

    assert logits.shape == (B, n_classes) and logits.dtype == jnp.float32
    ref = reference_forward(x, true_false, params)
    np.testing.assert_allclose(np.asarray(logits), np.asarray(ref), rtol=2e-2, atol=2e-2)
    print("KERNEL_OK")
</pallas_src>

<mosaic_0001>
module attributes {stable_mosaic.version = 11 : i64} {
  func.func @_dense_gelu_kernel(%arg0: i32, %arg1: i32, %arg2: memref<16x256xbf16, #tpu.memory_space<vmem>>, %arg3: memref<128x128xbf16, #tpu.memory_space<vmem>>, %arg4: memref<1x256xf32, #tpu.memory_space<vmem>>, %arg5: memref<16x128xf32, #tpu.memory_space<vmem>>, %arg6: memref<16x128xf32, #tpu.memory_space<vmem>>) attributes {dimension_semantics = [#tpu.dimension_semantics<parallel>, #tpu.dimension_semantics<arbitrary>], iteration_bounds = array<i64: 2, 2>, scalar_prefetch = 0 : i64, scratch_operands = 1 : i64, tpu.core_type = #tpu.core_type<tc>, window_params = [{pipeline_mode = #tpu.pipeline_mode<synchronous>, transform_indices = @transform_0, window_bounds = array<i64: 16, 256>}, {transform_indices = @transform_1, window_bounds = array<i64: 128, 128>}, {pipeline_mode = #tpu.pipeline_mode<synchronous>, transform_indices = @transform_2, window_bounds = array<i64: 1, 256>}, {transform_indices = @transform_3, window_bounds = array<i64: 16, 128>}]} {
    %c0_i32 = arith.constant 0 : i32
    %0 = arith.cmpi eq, %arg1, %c0_i32 : i32
    %1 = arith.extui %0 : i1 to i32
    %c0_i32_0 = arith.constant 0 : i32
    %2 = arith.cmpi ne, %1, %c0_i32_0 : i32
    scf.if %2 {
      %c128_i32_8 = arith.constant 128 : i32
      %15 = arith.muli %arg0, %c128_i32_8 : i32
      %16 = tpu.assume_multiple %15, 128 : i32
      %cst_9 = arith.constant 0.000000e+00 : f32
      %17 = vector.broadcast %cst_9 : f32 to vector<16x128xf32>
      %c0_10 = arith.constant 0 : index
      %18 = arith.index_cast %16 : i32 to index
      %19 = vector.load %arg4[%c0_10, %18] : memref<1x256xf32, #tpu.memory_space<vmem>>, vector<1x128xf32>
      %20 = vector.broadcast %19 : vector<1x128xf32> to vector<16x128xf32>
      %21 = arith.addf %17, %20 : vector<16x128xf32>
      %c0_11 = arith.constant 0 : index
      %c0_12 = arith.constant 0 : index
      %22 = vector.load %arg6[%c0_11, %c0_12] : memref<16x128xf32, #tpu.memory_space<vmem>>, vector<16x128xf32>
      tpu.vector_store %arg6[%c0_11, %c0_12], %21 {strides = array<i32>} : memref<16x128xf32, #tpu.memory_space<vmem>>, vector<16x128xf32>,
    } else {
    }
    %c128_i32 = arith.constant 128 : i32
    %3 = arith.muli %arg1, %c128_i32 : i32
    %4 = tpu.assume_multiple %3, 128 : i32
    %c0 = arith.constant 0 : index
    %c0_1 = arith.constant 0 : index
    %5 = vector.load %arg6[%c0, %c0_1] : memref<16x128xf32, #tpu.memory_space<vmem>>, vector<16x128xf32>
    %c0_2 = arith.constant 0 : index
    %6 = arith.index_cast %4 : i32 to index
    %7 = vector.load %arg2[%c0_2, %6] : memref<16x256xbf16, #tpu.memory_space<vmem>>, vector<16x128xbf16>
    %c0_3 = arith.constant 0 : index
    %c0_4 = arith.constant 0 : index
    %8 = vector.load %arg3[%c0_3, %c0_4] : memref<128x128xbf16, #tpu.memory_space<vmem>>, vector<128x128xbf16>
    %cst = arith.constant dense<0.000000e+00> : vector<16x128xf32>
    %9 = tpu.matmul %7, %8, %cst {dimension_numbers = #tpu.dot_dimension_numbers<[1], [0], [0], [1], [0, 0, 1, 1], [], []>} : vector<16x128xbf16>, vector<128x128xbf16>, vector<16x128xf32> -> vector<16x128xf32>
    %10 = arith.addf %5, %9 : vector<16x128xf32>
    %c0_5 = arith.constant 0 : index
    %c0_6 = arith.constant 0 : index
    %11 = vector.load %arg6[%c0_5, %c0_6] : memref<16x128xf32, #tpu.memory_space<vmem>>, vector<16x128xf32>
    tpu.vector_store %arg6[%c0_5, %c0_6], %10 {strides = array<i32>} : memref<16x128xf32, #tpu.memory_space<vmem>>, vector<16x128xf32>,
    %c1_i32 = arith.constant 1 : i32
    %12 = arith.cmpi eq, %arg1, %c1_i32 : i32
    %13 = arith.extui %12 : i1 to i32
    %c0_i32_7 = arith.constant 0 : i32
    %14 = arith.cmpi ne, %13, %c0_i32_7 : i32
    scf.if %14 {
      %c0_8 = arith.constant 0 : index
      %c0_9 = arith.constant 0 : index
      %15 = vector.load %arg6[%c0_8, %c0_9] : memref<16x128xf32, #tpu.memory_space<vmem>>, vector<16x128xf32>
      %cst_10 = arith.constant 5.000000e-01 : f32
      %16 = vector.broadcast %cst_10 : f32 to vector<16x128xf32>
      %17 = arith.mulf %16, %15 : vector<16x128xf32>
      %cst_11 = arith.constant 0.707106769 : f32
      %18 = vector.broadcast %cst_11 : f32 to vector<16x128xf32>
      %19 = arith.mulf %15, %18 : vector<16x128xf32>
      %20 = math.erf %19 : vector<16x128xf32>
      %cst_12 = arith.constant 1.000000e+00 : f32
      %21 = vector.broadcast %cst_12 : f32 to vector<16x128xf32>
      %22 = arith.addf %21, %20 : vector<16x128xf32>
      %23 = arith.mulf %17, %22 : vector<16x128xf32>
      %c0_13 = arith.constant 0 : index
      %c0_14 = arith.constant 0 : index
      %24 = vector.load %arg5[%c0_13, %c0_14] : memref<16x128xf32, #tpu.memory_space<vmem>>, vector<16x128xf32>
      tpu.vector_store %arg5[%c0_13, %c0_14], %23 {strides = array<i32>} : memref<16x128xf32, #tpu.memory_space<vmem>>, vector<16x128xf32>,
    } else {
    }
    return
  }
  func.func @transform_0(%arg0: i32, %arg1: i32) -> (i32, i32) {
    %c0_i32 = arith.constant 0 : i32
    %c0_i32_0 = arith.constant 0 : i32
    %c0_i32_1 = arith.constant 0 : i32
    return %c0_i32, %c0_i32_0 : i32, i32
  }
  func.func @transform_1(%arg0: i32, %arg1: i32) -> (i32, i32) {
    %c0_i32 = arith.constant 0 : i32
    return %arg1, %arg0 : i32, i32
  }
  func.func @transform_2(%arg0: i32, %arg1: i32) -> (i32, i32) {
    %c0_i32 = arith.constant 0 : i32
    %c0_i32_0 = arith.constant 0 : i32
    %c0_i32_1 = arith.constant 0 : i32
    return %c0_i32, %c0_i32_0 : i32, i32
  }
  func.func @transform_3(%arg0: i32, %arg1: i32) -> (i32, i32) {
    %c0_i32 = arith.constant 0 : i32
    %c0_i32_0 = arith.constant 0 : i32
    return %c0_i32, %arg0 : i32, i32
  }
}

</mosaic_0001>

<bundles_post_ra>
// kernel: tpu_custom_call.1
= control target key start
LH: loop header
LB: loop body
LE: loop exit
PB: predicated region body
PF: predicated region fallthrough
CT: control target
= control target key end

     0   :  { %s1166_s0 = inlined_call_operand.hbm [shape: bf16[16,256], index: 0, kind: input, shape index: {}]   ;;  %s1167_s1 = inlined_call_operand.hbm [shape: bf16[256,256], index: 1, kind: input, shape index: {}]   ;;  %s1168_s2 = inlined_call_operand.vmem [shape: f32[1,256], index: 2, kind: input, shape index: {}]   ;;  %s1169_s3 = inlined_call_operand.hbm [shape: f32[16,256], index: 3, kind: output, shape index: {}]  }
   0x1   :  { %1181 = sst [smem:[#allocation18_spill]] %s1166_s0 }
   0x2   :  { %8 = vsyncpa [#allocation4], 0 }
   0x3   :  { %9 = vsyncpa [#allocation7], 0 }
   0x4   :  { %11 = vsyncpa [#allocation7 + $0x1], 0 }
   0x5   :  { %12 = vsyncpa [#allocation5], 0 }
   0x6   :  { %14 = vsyncpa [#allocation5 + $0x1], 0  ;;  %s905_s12 = smov 0   ;;  %s907_s13 = smov 0  }
   0x7   :  { %s909_s14 = smov 0   ;;  %s911_s15 = smov 0  }
   0x8   :  { %s913_s16 = smov 0   ;;  %s915_s17 = smov 0  }
   0x9   :  { %s917_s18 = smov 0   ;;  %s919_s19 = smov 0  }
   0xa   :  { %s921_s20 = smov 0   ;;  %s923_s21 = smov 0  }
   0xb   :  { %s925_s22 = smov 0  }
   0xc LB: > { %1182 = sst [smem:[#allocation12_spill]] %s831_s12  ;;  %s496_s23 = sadd.s32 4294967295, %s871_s22   ;;  %s871_s22 = sphi %s925_s22, %s20_s22   ;;  %s867_s21 = sphi %s923_s21, %s1218_s21   ;;  %s863_s20 = sphi %s921_s20, %s1217_s20   ;;  %s859_s19 = sphi %s919_s19, %s1216_s19   ;;  %s855_s18 = sphi %s917_s18, %s1207_s18   ;;  %s851_s17 = sphi %s915_s17, %s1215_s17   ;;  %s847_s16 = sphi %s913_s16, %s1214_s16   ;;  %s843_s15 = sphi %s911_s15, %s1213_s15   ;;  %s839_s14 = sphi %s909_s14, %s1212_s14   ;;  %s835_s13 = sphi %s907_s13, %s1211_s13   ;;  %s831_s12 = sphi %s905_s12, %s1210_s12  }
   0xd   : > { %1183 = sst [smem:[#allocation13_spill]] %s863_s20  ;;  %s497_s24 = sadd.s32 4294967294, %s871_s22  }
   0xe   : > { %1184 = sst [smem:[#allocation14_spill]] %s871_s22  ;;  %p69_p0 = scmp.ne.s32.totalorder %s851_s17, %s847_s16 }
   0xf   : > { %p70_p1 = scmp.eq.s32.totalorder %s871_s22, 0  ;;  %p75_p2 = scmp.ne.s32.totalorder %s847_s16, %s843_s15 }
  0x10   : > { %p965_p3 = scmp.eq.s32.totalorder %s496_s23, 0  ;;  %p119_p5 = scmp.ne.s32.totalorder %s839_s14, %s835_s13 }
  0x11   : > { %p970_p4 = por %p70_p1, %p69_p0  ;;  %p120_p7 = scmp.eq.s32.totalorder %s496_s23, 3 }
  0x12   : > { %p978_p6 = por %p965_p3, %p75_p2  ;;  %p125_p8 = scmp.ne.s32.totalorder %s835_s13, %s831_s12 }
  0x13   : > { %p126_p9 = scmp.eq.s32.totalorder %s497_s24, 3  ;;  %p984_p10 = por %p120_p7, %p119_p5 }
  0x14   : > { %s1187_s29 = scalar_select %p978_p6, 1, 0 }
  0x15   : > { %s1188_s30 = scalar_select %p984_p10, 1, 0 }
  0x16   : > { %p498_p11 = scmp.ge.s32.totalorder %s871_s22, 1  ;;  %p989_p12 = por %p126_p9, %p125_p8 }
  0x17   : > { %p133_p13 = scmp.lt.s32.totalorder %s871_s22, 5  ;;  %s873_s6 = smov [#allocation3]  }
  0x18   : > { %s1189_s4 = scalar_select %p989_p12, 1, 0 }
  0x19   : > { %p994_p0 = pnand %p498_p11, %p133_p13  ;;  %s145_s7 = sshll.u32 %s873_s6, 4  ;;  %s146_s7 = int_to_ptr.vmem [resolvable:$true] %s145_s7 }
  0x1a   : > { %1190 = sst [smem:[#allocation15_spill]] %s1189_s4  ;;  %p579_p2 = scmp.lt.s32.totalorder %s871_s22, 4 }
  0x1b   : > { %s1191_s5 = scalar_select %p994_p0, 1, 0 }
  0x1c   : > { %p566_p1 = pneg %p994_p0  ;;  %p1009_p7 = pnand %p579_p2, %p970_p4 }
  0x1d   : > { %s704_s10 = scalar_lea.vmem %s146_s7, 256  ;;  %p712_p12 = scmp.lt.s32.totalorder %s146_s7, %s146_s7 }
  0x1e   : > { %p1003_p5 = pnand %p566_p1, %p965_p3  ;;  %p705_p9 = scmp.ne.s32.totalorder %s146_s7, %s704_s10 }
  0x1f   : > { %p713_p10 = scmp.lt.s32.totalorder %s704_s10, %s704_s10 }
  0x20   : > { %p695_p8 = pneg %p1003_p5 }
  0x21   : > { %p714_p6 = por %p713_p10, %p712_p12 }
  0x22   : > { %p707_p11 = pnand %p705_p9, %p695_p8 }
  0x24   : > { %p708_p13 = pneg %p707_p11 }
  0x26   : > { %p715_p0 = pnand %p714_p6, %p708_p13 }
  0x28   : > { %718 = shalt.err (!%p715_p0)
}
  0x29   : > { %s1173_s11 = smov 128   ;;  %s875_s15 = smov 8  }
  0x2a   : > { %s1194_s0 = sld [smem:[#allocation18_spill]]  ;;  %s29_s28 = sadd.s32 1, %s863_s20 }
  0x2b   : > { %s32_s6 = sadd.s32 1, %s867_s21  ;;  %p30_p4 = scmp.ge.s32.totalorder %s29_s28, 2 }
  0x2c   : > { %s162_s10 = sand.u32 1, %s851_s17   ;;  %s528_s27 = sshll.u32 %s863_s20, 5 }
  0x2d   : > { %s501_s25 = sshll.u32 %s162_s10, 6  ;;  %s1220_s28 = smov (%p30_p4, %s29_s28), 0 }
  0x2e   : > { %1195 = sst [smem:[#allocation16_spill]] %s1220_s28  ;;  %s1222_s6 = smov (!%p30_p4, %s32_s6), %s867_s21 }
  0x2f   : > { %s57_s8 = ssub.s32 %s863_s20, %s1220_s28  ;;  %p34_p6 = scmp.ge.s32.totalorder %s1222_s6, 2 }
  0x30   : > { %569 = dma.hbm_to_vmem [thread:$0]  (!%p1003_p5), %s1194_s0, 256, %s146_s7, [#allocation4], %s1173_s11, %s1173_s11, %s875_s15  }
  0x31   : > { %s172_s23 = sadd.s32 %s867_s21, %s528_s27  ;;  %s166_s7 = scalar_lea.vmem [#allocation6], %s501_s25 }
  0x32   : > { %s175_s15 = sshll.u32 %s166_s7, 4  ;;  %s1224_s6 = smov (%p34_p6, %s1222_s6), 0  ;;  %s1034_s15 = int_to_ptr.vmem [resolvable:$true] %s175_s15 }
  0x33   : > { %1196 = sst [smem:[#allocation17_spill]] %s1224_s6  ;;  %s504_s24 = sshll.u32 %s172_s23, 6 }
  0x34   : > { %s58_s11 = ssub.s32 %s867_s21, %s1224_s6  ;;  %s174_s12 = scalar_lea.hbm %s1167_s1, %s504_s24 }
  0x35   : > { %s59_s28 = sor.u32 %s58_s11, %s57_s8  ;;  %p107_p10 = scmp.eq.s32.totalorder %s58_s11, 0 }
  0x36   : > { %p60_p12 = scmp.eq.s32.totalorder %s59_s28, 0  ;;  %s1197_s27 = sadd.s32 1, %s839_s14 }
  0x37   : > { %s1044_s25 = scalar_select %p107_p10, %s839_s14, %s1197_s27  }
  0x38   : > { %s1198_s7 = sadd.s32 1, %s851_s17  ;;  %s163_s23 = scalar_lea.sflag [#allocation7], %s162_s10 }
  0x39   : > { %s1049_s20 = scalar_select %p60_p12, %s851_s17, %s1198_s7  }
  0x3a   : > { %p721_p0 = pneg %p1009_p7  ;;  %s732_s22 = scalar_lea.vmem %s1034_s15, 1024 }
  0x3b   : > { %p733_p1 = scmp.ne.s32.totalorder %s1034_s15, %s732_s22  ;;  %s876_s6 = smov [#allocation6]  }
  0x3c   : > { %s737_s0 = sshll.u32 %s876_s6, 4  ;;  %s738_s0 = int_to_ptr.vmem [resolvable:$false] %s737_s0 }
  0x3d   : > { %p735_p2 = pnand %p733_p1, %p721_p0  ;;  %s739_s4 = scalar_lea.vmem %s738_s0, 2048 }
  0x3e   : > { %p740_p8 = scmp.lt.s32.totalorder %s1034_s15, %s738_s0  ;;  %p741_p9 = scmp.lt.s32.totalorder %s739_s4, %s732_s22 }
  0x3f   : > { %p736_p5 = pneg %p735_p2 }
  0x40   : > { %p742_p11 = por %p741_p9, %p740_p8 }
  0x42   : > { %p743_p13 = pnand %p742_p11, %p736_p5 }
  0x44   : > { %746 = shalt.err (!%p743_p13)
}
  0x45   : > { %s877_s11 = smov 64   ;;  %s878_s28 = smov 4  }
  0x46   : > { %s1199_s10 = smov 128   ;;  %p1200_p4 = scmp.ne.s32.totalorder %s1191_s5, 0 }
  0x47   : > { %573 = dma.hbm_to_vmem [thread:$0]  (!%p1009_p7), %s174_s12, 1024, %s1034_s15, %s163_s23, %s1199_s10, %s877_s11, %s878_s28  }
  0x48   : > { %187 = sbr.rel (%p1200_p4) target bundleno = 378 (0x17a), region = 32 }
  0x4d   : > { %818 = dma.done.wait (%p965_p3), [#allocation4], 256  }
  0x4e   : > { %820 = vsyncadd (%p965_p3), [#allocation4], 4294967040  ;;  %s193_s22 = sand.u32 1, %s847_s16   ;;  %p1201_p6 = scmp.ne.s32.totalorder %s1187_s29, 0 }
  0x4f   : > { %s507_s6 = sshll.u32 %s193_s22, 6  ;;  %s194_s8 = scalar_lea.sflag [#allocation7], %s193_s22 }
  0x50   : > { %s1067_s24 = scalar_lea.vmem [#allocation6], %s507_s6 }
  0x51   : > { %822 = dma.done.wait (%p1201_p6), %s194_s8, 1024  }
  0x52   : > { %824 = vsyncadd (%p1201_p6), %s194_s8, 4294966272  ;;  %s217_s12 = sand.u32 1, %s835_s13   ;;  %p509_p3 = scmp.ne.s32.totalorder %s855_s18, 0 }
  0x53   : > { %s508_s5 = sshll.u32 %s217_s12, 4  ;;  %s510_s26 = sshll.u32 (!%p509_p3), %s859_s19, 7 }
  0x54   : > { %s1076_s9 = scalar_lea.vmem [#allocation8], %s508_s5  ;;  %225 = sbr.rel (%p509_p3) target bundleno = 91 (0x5b), region = 44 }
  0x55   : > { %s227_s15 = sshra.s32 (!%p509_p3), %s510_s26, 7 }
  0x56   : > { %s229_s23 = scalar_lea.vmem (!%p509_p3), %s1168_s2, %s227_s15 }
  0x59   : > { %v511_v0 = vld [vmem:[%s229_s23] ss:$0 sm:$0xff] }
  0x5a   : > { %238 = vst [vmem:[#allocation2] sm:$0xff] %v511_v0  ;;  %239 = vst [vmem:[#allocation2 + $0x8] sm:$0xff] %v511_v0 }
  0x5b PF: > { %v680_v1 = vld [vmem:[%s1067_s24 + $0x38] sm:$0xff]   ;;  %v879_v2 = vmov 0.0   ;;  %v681_v3 = vld [vmem:[%s1067_s24 + $0x30] sm:$0xff]   ;;  %vm880_vm0 = vmmov 0   ;;  %s512_s29 = sshll.u32 %s855_s18, 7  ;;  %v682_v4 = vld [vmem:[%s1067_s24 + $0x28] sm:$0xff]  }
  0x5c   : > { %538 = vmatprep.subr.bf16.mxu0 %v879_v2  ;;  %554 = vmatprep.mubr.msk.bf16.mxu0 %vm880_vm0, %v879_v2  ;;  %s243_s0 = sshra.s32 %s512_s29, 7  ;;  %v683_v5 = vld [vmem:[%s1067_s24 + $0x20] sm:$0xff]   ;;  %v684_v6 = vld [vmem:[%s1067_s24 + $0x18] sm:$0xff]   ;;  %v685_v7 = vld [vmem:[%s1067_s24 + $0x10] sm:$0xff]   ;;  %p523_p7 = scmp.ne.s32.totalorder %s855_s18, 1 }
  0x5d   : > { %539 = vmatpush3.bf16.msra.mxu0 %v680_v1  ;;  %s513_s4 = sshll.u32 %s243_s0, 2  ;;  %v686_v8 = vld [vmem:[%s1067_s24 + $0x8] sm:$0xff]   ;;  %v687_v9 = vld [vmem:[%s1067_s24] sm:$0xff]  }
  0x5e   : > { %540 = vmatprep.subr.bf16.mxu0 %v879_v2  ;;  %s246_s11 = scalar_lea.vmem [#allocation3], %s513_s4 }
  0x5f   : > { %v688_v10 = vld [vmem:[%s246_s11] ss:$8 sps:$4 sm:$0xff]  }
  0x61   : > { %541 = vmatpush3.bf16.msra.mxu0 %v681_v3  ;;  %v241_v11 = vld [vmem:[#allocation2] sm:$0xff]  ;;  %v242_v15 = vld [vmem:[#allocation2 + $0x8] sm:$0xff] }
  0x62   : > { %542 = vmatprep.subr.bf16.mxu0 %v879_v2 }
  0x65   : > { %543 = vmatpush3.bf16.msra.mxu0 %v682_v4 }
  0x66   : > { %544 = vmatprep.subr.bf16.mxu0 %v879_v2 }
  0x69   : > { %545 = vmatpush3.bf16.msra.mxu0 %v683_v5 }
  0x6a   : > { %546 = vmatprep.subr.bf16.mxu0 %v879_v2 }
  0x6d   : > { %547 = vmatpush3.bf16.msra.mxu0 %v684_v6 }
  0x6e   : > { %548 = vmatprep.subr.bf16.mxu0 %v879_v2 }
  0x71   : > { %549 = vmatpush3.bf16.msra.mxu0 %v685_v7 }
  0x72   : > { %550 = vmatprep.subr.bf16.mxu0 %v879_v2 }
  0x75   : > { %551 = vmatpush3.bf16.msra.mxu0 %v686_v8 }
  0x76   : > { %552 = vmatprep.subr.bf16.mxu0 %v879_v2 }
  0x79   : > { %553 = vmatpush3.bf16.msra.mxu0 %v687_v9 }
  0x7c   : > { %555 = vmatmul.mubr.bf16.vlgmr.msra.gmra.mxu0 %v688_v10 }
 0x13c   : > { %v353_v12 = vpop.f32.mrf.mxu0 }
 0x13d   : > { %v360_v13 = vadd.f32 %v353_v12, %v241_v11 }
 0x13e   : > { %v556_v14 = vpop.f32.mrf.mxu0 }
 0x13f   : > { %362 = vst [vmem:[#allocation2] sm:$0xff] %v360_v13  ;;  %367 = sbr.rel (%p523_p7) target bundleno = 352 (0x160), region = 48 }
 0x140   : > { %v356_v16 = vpop.f32.mrf.mxu0 }
 0x141   : > { %v361_v17 = vadd.f32 %v356_v16, %v242_v15 }
 0x142   : > { %v557_v18 = vpop.f32.mrf.mxu0 }
 0x143   : > { %363 = vst [vmem:[#allocation2 + $0x8] sm:$0xff] %v361_v17 }
 0x146   : > { %v368_v19 = vld [vmem:[#allocation2] sm:$0xff] }
 0x147   : > { %v372_v21 = vmul.f32 0.70710677, %v368_v19  ;;  %v370_v23 = vmul.f32 0.5, %v368_v19 }
 0x149   : > { %689 = verf.f32 %v372_v21 }
 0x14a   : > { %v369_v20 = vld [vmem:[#allocation2 + $0x8] sm:$0xff] }
 0x14b   : > { %v373_v22 = vmul.f32 0.70710677, %v369_v20  ;;  %v371_v25 = vmul.f32 0.5, %v369_v20 }
 0x14d   : > { %691 = verf.f32 %v373_v22 }
 0x156   : > { %v690_v24 = vpop.eup %689 }
 0x157   : > { %v376_v27 = vadd.f32 1.0, %v690_v24 }
 0x159   : > { %v378_v29 = vmul.f32 %v376_v27, %v370_v23 }
 0x15a   : > { %v692_v26 = vpop.eup %691 }
 0x15b   : > { %v377_v28 = vadd.f32 1.0, %v692_v26  ;;  %380 = vst [vmem:[%s1076_s9] sm:$0xff] %v378_v29 }
 0x15d   : > { %v379_v30 = vmul.f32 %v377_v28, %v371_v25 }
 0x15f   : > { %381 = vst [vmem:[%s1076_s9 + $0x8] sm:$0xff] %v379_v30 }
 0x160 PF: > { %s525_s18 = sshll.u32 %s859_s19, 7  ;;  %s395_s6 = sshll.u32 %s1076_s9, 4  ;;  %s1102_s6 = int_to_ptr.vmem [resolvable:$true] %s395_s6 }
 0x161   : > { %s1099_s22 = scalar_lea.hbm %s1169_s3, %s525_s18  ;;  %s1106_s8 = scalar_lea.sflag [#allocation5], %s217_s12 }
 0x162   : > { %s747_s24 = scalar_lea.vmem %s1102_s6, 256  ;;  %p1202_p12 = scmp.ne.s32.totalorder %s1188_s30, 0 }
 0x163   : > { %p748_p10 = scmp.ne.s32.totalorder %s1102_s6, %s747_s24  ;;  %s881_s19 = smov [#allocation8]  }
 0x164   : > { %s751_s5 = sshll.u32 %s881_s19, 4  ;;  %s752_s5 = int_to_ptr.vmem [resolvable:$false] %s751_s5 }
 0x165   : > { %p749_p0 = pnand %p748_p10, %p1202_p12  ;;  %s753_s26 = scalar_lea.vmem %s752_s5, 512 }
 0x166   : > { %p754_p2 = scmp.lt.s32.totalorder %s1102_s6, %s752_s5  ;;  %p755_p5 = scmp.lt.s32.totalorder %s753_s26, %s747_s24 }
 0x167   : > { %p750_p1 = pneg %p749_p0 }
 0x168   : > { %p756_p8 = por %p755_p5, %p754_p2 }
 0x16a   : > { %p757_p9 = pnand %p756_p8, %p750_p1 }
 0x16c   : > { %760 = shalt.err (!%p757_p9)
}
 0x16d   : > { %s761_s12 = scalar_lea.hbm %s1099_s22, 256  ;;  %s765_s27 = scalar_lea.hbm %s1169_s3, 512 }
 0x16e   : > { %p762_p11 = scmp.ne.s32.totalorder %s1099_s22, %s761_s12  ;;  %p766_p6 = scmp.lt.s32.totalorder %s1099_s22, %s1169_s3 }
 0x16f   : > { %p767_p3 = scmp.lt.s32.totalorder %s765_s27, %s761_s12 }
 0x170   : > { %p763_p13 = pnand %p762_p11, %p1202_p12 }
 0x171   : > { %p768_p7 = por %p767_p3, %p766_p6 }
 0x172   : > { %p764_p4 = pneg %p763_p13 }
 0x174   : > { %p769_p10 = pnand %p768_p7, %p764_p4 }
 0x176   : > { %772 = shalt.err (!%p769_p10)
}
 0x177   : > { %s882_s29 = smov 128   ;;  %s883_s0 = smov 256  }
 0x178   : > { %s884_s4 = smov 8  }
 0x179   : > { %564 = dma.vmem_to_hbm [thread:$0]  (%p1202_p12), %s1102_s6, 256, %s1099_s22, %s1106_s8, %s882_s29, %s883_s0, %s884_s4  }
 0x17a PF: > { %s1203_s11 = sld [smem:[#allocation14_spill]] }
 0x17b   : > { %s1204_s18 = sld [smem:[#allocation12_spill]] }
 0x17c   : > { %s1205_s28 = sld [smem:[#allocation15_spill]] }
 0x180   : > { %p581_p0 = scmp.ge.s32.totalorder %s1203_s11, 2 }
 0x181   : > { %s410_s10 = sand.u32 1, %s1204_s18  }
 0x182   : > { %p1206_p1 = scmp.ne.s32.totalorder %s1205_s28, 0  ;;  %s411_s24 = scalar_lea.sflag [#allocation5], %s410_s10 }
 0x184   : > { %p575_p2 = pnand %p581_p0, %p1206_p1 }
 0x186   : > { %p576_p5 = pneg %p575_p2 }
 0x188   : > { %826 = dma.done.wait (%p576_p5), %s411_s24, 256  }
 0x189   : > { %828 = vsyncadd (%p576_p5), %s411_s24, 4294967040  ;;  %s20_s22 = sadd.s32 1, %s1203_s11   ;;  %s1207_s18 = sld [smem:[#allocation13_spill]] }
 0x18a   : > { %p17_p8 = scmp.ge.s32.totalorder %s20_s22, 6   ;;  %s1208_s30 = sld [smem:[#allocation16_spill]] }
 0x18b   : > { %s1209_s6 = sld [smem:[#allocation17_spill]]  ;;  %s1210_s12 = smov %s835_s13 }
 0x18c   : > { %s1211_s13 = smov %s839_s14  ;;  %s1212_s14 = smov %s1044_s25 }
 0x18d   : > { %s1213_s15 = smov %s847_s16  ;;  %s1214_s16 = smov %s851_s17 }
 0x18e   : > { %s1215_s17 = smov %s1049_s20  ;;  %s1216_s19 = smov %s867_s21 }
 0x18f   :  { %19 = sbr.rel (!%p17_p8) target bundleno = 12 (0xc), region = 92 }
 0x190   : > { %s1217_s20 = smov %s1208_s30 }
 0x191   : > { %s1218_s21 = smov %s1209_s6 }
 0x194   :  { %416 = vsyncpa [#allocation4], 1 }
 0x195   :  { %418 = vsyncpa [#allocation4 + $0x1], 1 }
 0x196   :  { %419 = vsyncpa [#allocation7], 1 }
 0x197   :  { %421 = vsyncpa [#allocation7 + $0x1], 1 }
 0x198   :  { %422 = vsyncpa [#allocation5], 1 }
 0x199   :  { %424 = vsyncpa [#allocation5 + $0x1], 1 }

</bundles_post_ra>
